<compile_context>
chip_gen: v6e
topology: v6e:2x2x1
jax: 0.10.0
libtpu: 0.0.40
codegen_flags: <defaults>
</compile_context>

<pallas_src>
import jax
import jax.numpy as jnp
from jax.experimental import pallas as pl
from jax.experimental.pallas import tpu as pltpu


_DEFAULT_VMEM_BUDGET = 24 * 1024 * 1024   # pipelined footprint budget (2 bufs x in+out)
_VMEM_LIMIT_BYTES = 32 * 1024 * 1024      # safe on v5e/v6e (128 MiB) and v7x (64 MiB)


def _offsets(channels):
    offs, o = [], 0
    for c in channels:
        offs.append(o)
        o += c
    return offs


# --------------------------------------------------------------------------
# Fast path: flattened (B, C*H*W) layout, dense lane-aligned stores,
# batch rows packed into the sublane dim of each block.
# --------------------------------------------------------------------------
def _make_flat_kernel(channels, hw):
    offs = _offsets(channels)

    def kernel(*refs):
        in_refs, out_ref = refs[:-1], refs[-1]
        for r, c, o in zip(in_refs, channels, offs):
            # Lane offset o*hw is a multiple of 128 whenever hw is (256 in the demo),
            # so each input is ONE unmasked, lane-dense store.
            out_ref[:, o * hw:(o + c) * hw] = r[...]

    return kernel


def _flat_batch_tile(B, c_total, hw, itemsize, budget):
    """Rows per block for the flat path, or None if the flat path does not fit.

    Pipelined footprint per grid step ~= 2 buffers x (all inputs + output)
                                       = 4 * tb * c_total * hw * itemsize.
    """
    row_bytes = c_total * hw * itemsize
    max_tb = budget // (4 * row_bytes)
    if max_tb >= B:
        return B                      # single grid step covers the whole batch
    if B % 8 == 0 and max_tb >= 8:
        best = 8
        t = 16
        while t <= max_tb:
            if B % t == 0:
                best = t
            t += 8
        return best                   # multiple of 8 that divides B
    return None                       # fall back to the spatially tiled 3-D path


def _concat_flat(xs, channels, B, hw, dtype, tb):
    c_total = sum(channels)
    xs_flat = [x.reshape(B, c * hw) for x, c in zip(xs, channels)]
    grid = (B // tb,)
    in_specs = [pl.BlockSpec((tb, c * hw), lambda b: (b, 0)) for c in channels]
    out_spec = pl.BlockSpec((tb, c_total * hw), lambda b: (b, 0))
    return pl.pallas_call(
        _make_flat_kernel(channels, hw),
        out_shape=jax.ShapeDtypeStruct((B, c_total * hw), dtype),
        grid_spec=pltpu.PrefetchScalarGridSpec(
            num_scalar_prefetch=0,
            grid=grid,
            in_specs=in_specs,
            out_specs=out_spec,
        ),
        compiler_params=pltpu.CompilerParams(
            dimension_semantics=("parallel",),
            vmem_limit_bytes=_VMEM_LIMIT_BYTES,
        ),
    )(*xs_flat)


# --------------------------------------------------------------------------
# Fallback path: (B, C, H*W) layout, spatial dim tiled at a multiple of 128
# with a cdiv grid (ragged last tile handled by Pallas).  Used when a single
# flattened row exceeds the VMEM budget or B has no usable sublane tiling.
# --------------------------------------------------------------------------
def _make_3d_kernel(channels):
    offs = _offsets(channels)

    def kernel(*refs):
        in_refs, out_ref = refs[:-1], refs[-1]
        for r, c, o in zip(in_refs, channels, offs):
            # Channel offsets may be sublane-misaligned (masked stores) -- correct,
            # slightly slower; this path only runs for very large rows.
            out_ref[:, o:o + c, :] = r[...]

    return kernel


def _spatial_tile(hw, c_total, itemsize, budget):
    max_t = budget // (4 * c_total * itemsize)
    if max_t >= hw:
        return hw                                   # full extent, single spatial block
    # Multiple-of-128 tile; if even 128 overshoots (huge c_total) we rely on the
    # vmem_limit_bytes headroom rather than silently failing.
    return max(128, (max_t // 128) * 128)


def _concat_3d(xs, channels, B, hw, dtype, budget):
    c_total = sum(channels)
    itemsize = jnp.dtype(dtype).itemsize
    xs3 = [x.reshape(B, c, hw) for x, c in zip(xs, channels)]
    t = _spatial_tile(hw, c_total, itemsize, budget)
    n_s = pl.cdiv(hw, t)
    in_specs = [pl.BlockSpec((1, c, t), lambda b, s: (b, 0, s)) for c in channels]
    out_spec = pl.BlockSpec((1, c_total, t), lambda b, s: (b, 0, s))
    return pl.pallas_call(
        _make_3d_kernel(channels),
        out_shape=jax.ShapeDtypeStruct((B, c_total, hw), dtype),
        grid_spec=pltpu.PrefetchScalarGridSpec(
            num_scalar_prefetch=0,
            grid=(B, n_s),
            in_specs=in_specs,
            out_specs=out_spec,
        ),
        compiler_params=pltpu.CompilerParams(
            dimension_semantics=("parallel", "arbitrary"),
            vmem_limit_bytes=_VMEM_LIMIT_BYTES,
        ),
    )(*xs3)


# --------------------------------------------------------------------------
# Public wrapper
# --------------------------------------------------------------------------
def pallas_concat_channels(xs, vmem_budget_bytes=_DEFAULT_VMEM_BUDGET):
    """torch.cat(xs, dim=1) for a list of NCHW arrays, as a Pallas TPU kernel."""
    xs = list(xs)
    assert len(xs) >= 1
    if len(xs) == 1:
        return xs[0]
    B, _, H, W = xs[0].shape
    dtype = xs[0].dtype
    for x in xs:
        assert x.ndim == 4 and x.shape[0] == B and x.shape[2:] == (H, W)
        assert x.dtype == dtype
    channels = [int(x.shape[1]) for x in xs]
    c_total = sum(channels)
    hw = H * W
    itemsize = jnp.dtype(dtype).itemsize

    tb = _flat_batch_tile(B, c_total, hw, itemsize, vmem_budget_bytes)
    if tb is not None:
        out = _concat_flat(xs, channels, B, hw, dtype, tb)
    else:
        out = _concat_3d(xs, channels, B, hw, dtype, vmem_budget_bytes)
    return out.reshape(B, c_total, H, W)


class Concat:
    """JAX/Pallas analogue of models/common.py::Concat (channel concat, dim=1)."""

    def __init__(self, dimension=1):
        assert dimension == 1, "Pallas kernel implements channel (dim=1) concat"
        self.d = dimension

    def __call__(self, x):
        return pallas_concat_channels(x)


if __name__ == "__main__":
    key = jax.random.PRNGKey(0)
    k1, k2, k3, k4 = jax.random.split(key, 4)

    # Three NCHW feature maps with different channel counts, mirroring a
    # YOLO-style skip-connection concat.
    x1 = jax.random.normal(k1, (2, 4, 16, 16), dtype=jnp.float32)
    x2 = jax.random.normal(k2, (2, 8, 16, 16), dtype=jnp.float32)
    x3 = jax.random.normal(k3, (2, 4, 16, 16), dtype=jnp.float32)
    ref = jnp.concatenate([x1, x2, x3], axis=1)

    # Default path: flat (B, C*HW) layout, dense 128-aligned stores, single grid step.
    concat = Concat(dimension=1)
    out = jax.block_until_ready(concat([x1, x2, x3]))
    assert out.shape == ref.shape, (out.shape, ref.shape)
    assert jnp.array_equal(out, ref), "flat-path mismatch vs jnp.concatenate"

    # Tiny VMEM budget forces the spatially tiled 3-D fallback (multi-step grid).
    out_3d = jax.block_until_ready(
        pallas_concat_channels([x1, x2, x3], vmem_budget_bytes=32 * 1024)
    )
    assert jnp.array_equal(out_3d, ref), "3d-fallback mismatch vs reference"

    # Exercise batch-sublane tiling on the flat path (B=16 -> tb=8, 2 grid steps).
    y1 = jax.random.normal(k4, (16, 4, 16, 16), dtype=jnp.float32)
    y2 = y1 * 2.0 + 1.0
    ref_y = jnp.concatenate([y1, y2], axis=1)
    out_y = jax.block_until_ready(
        pallas_concat_channels([y1, y2], vmem_budget_bytes=256 * 1024)
    )
    assert jnp.array_equal(out_y, ref_y), "batch-tiled flat-path mismatch vs reference"

    print("KERNEL_OK")
</pallas_src>

<mosaic_0001>
module attributes {stable_mosaic.version = 11 : i64} {
  func.func @kernel(%arg0: i32, %arg1: memref<2x1024xf32, #tpu.memory_space<vmem>>, %arg2: memref<2x2048xf32, #tpu.memory_space<vmem>>, %arg3: memref<2x1024xf32, #tpu.memory_space<vmem>>, %arg4: memref<2x4096xf32, #tpu.memory_space<vmem>>) attributes {dimension_semantics = [#tpu.dimension_semantics<parallel>], iteration_bounds = array<i64: 1>, scalar_prefetch = 0 : i64, scratch_operands = 0 : i64, tpu.core_type = #tpu.core_type<tc>, window_params = [{transform_indices = @transform_0, window_bounds = array<i64: 2, 1024>}, {transform_indices = @transform_1, window_bounds = array<i64: 2, 2048>}, {transform_indices = @transform_2, window_bounds = array<i64: 2, 1024>}, {transform_indices = @transform_3, window_bounds = array<i64: 2, 4096>}]} {
    %c0 = arith.constant 0 : index
    %c0_0 = arith.constant 0 : index
    %0 = vector.load %arg1[%c0, %c0_0] : memref<2x1024xf32, #tpu.memory_space<vmem>>, vector<2x1024xf32>
    %c0_1 = arith.constant 0 : index
    %c0_2 = arith.constant 0 : index
    %1 = vector.load %arg4[%c0_1, %c0_2] : memref<2x4096xf32, #tpu.memory_space<vmem>>, vector<2x1024xf32>
    tpu.vector_store %arg4[%c0_1, %c0_2], %0 {strides = array<i32>} : memref<2x4096xf32, #tpu.memory_space<vmem>>, vector<2x1024xf32>,
    %c0_3 = arith.constant 0 : index
    %c0_4 = arith.constant 0 : index
    %2 = vector.load %arg2[%c0_3, %c0_4] : memref<2x2048xf32, #tpu.memory_space<vmem>>, vector<2x2048xf32>
    %c0_5 = arith.constant 0 : index
    %c1024 = arith.constant 1024 : index
    %3 = vector.load %arg4[%c0_5, %c1024] : memref<2x4096xf32, #tpu.memory_space<vmem>>, vector<2x2048xf32>
    tpu.vector_store %arg4[%c0_5, %c1024], %2 {strides = array<i32>} : memref<2x4096xf32, #tpu.memory_space<vmem>>, vector<2x2048xf32>,
    %c0_6 = arith.constant 0 : index
    %c0_7 = arith.constant 0 : index
    %4 = vector.load %arg3[%c0_6, %c0_7] : memref<2x1024xf32, #tpu.memory_space<vmem>>, vector<2x1024xf32>
    %c0_8 = arith.constant 0 : index
    %c3072 = arith.constant 3072 : index
    %5 = vector.load %arg4[%c0_8, %c3072] : memref<2x4096xf32, #tpu.memory_space<vmem>>, vector<2x1024xf32>
    tpu.vector_store %arg4[%c0_8, %c3072], %4 {strides = array<i32>} : memref<2x4096xf32, #tpu.memory_space<vmem>>, vector<2x1024xf32>,
    return
  }
  func.func @transform_0(%arg0: i32) -> (i32, i32) {
    %c0_i32 = arith.constant 0 : i32
    %c0_i32_0 = arith.constant 0 : i32
    return %arg0, %c0_i32 : i32, i32
  }
  func.func @transform_1(%arg0: i32) -> (i32, i32) {
    %c0_i32 = arith.constant 0 : i32
    %c0_i32_0 = arith.constant 0 : i32
    return %arg0, %c0_i32 : i32, i32
  }
  func.func @transform_2(%arg0: i32) -> (i32, i32) {
    %c0_i32 = arith.constant 0 : i32
    %c0_i32_0 = arith.constant 0 : i32
    return %arg0, %c0_i32 : i32, i32
  }
  func.func @transform_3(%arg0: i32) -> (i32, i32) {
    %c0_i32 = arith.constant 0 : i32
    %c0_i32_0 = arith.constant 0 : i32
    return %arg0, %c0_i32 : i32, i32
  }
}

</mosaic_0001>

<bundles_post_ra>
// kernel: tpu_custom_call.1
= control target key start
LH: loop header
LB: loop body
LE: loop exit
PB: predicated region body
PF: predicated region fallthrough
CT: control target
= control target key end

     0   :  { %8 = vsyncpa [#allocation3], 0  ;;  %s208_s0 = inlined_call_operand.hbm [shape: f32[2,1024], index: 0, kind: input, shape index: {}]   ;;  %s209_s1 = inlined_call_operand.hbm [shape: f32[2,2048], index: 1, kind: input, shape index: {}]   ;;  %s210_s2 = inlined_call_operand.hbm [shape: f32[2,1024], index: 2, kind: input, shape index: {}]   ;;  %s211_s3 = inlined_call_operand.hbm [shape: f32[2,4096], index: 3, kind: output, shape index: {}]  }
   0x1   :  { %9 = vsyncpa [#allocation6], 0 }
   0x2   :  { %10 = vsyncpa [#allocation4], 0  ;;  %s172_s12 = smov [#allocation5]   ;;  %s173_s14 = smov [#allocation2]  }
   0x3   :  { %s27_s13 = sshll.u32 %s172_s12, 4  ;;  %s17_s15 = sshll.u32 %s173_s14, 4  ;;  %s28_s13 = int_to_ptr.vmem [resolvable:$true] %s27_s13  ;;  %s18_s15 = int_to_ptr.vmem [resolvable:$true] %s17_s15 }
   0x4   :  { %s94_s16 = scalar_lea.vmem %s28_s13, 512  ;;  %p99_p1 = scmp.lt.s32.totalorder %s28_s13, %s28_s13 }
   0x5   :  { %p95_p0 = scmp.ne.s32.totalorder %s28_s13, %s94_s16  ;;  %p100_p2 = scmp.lt.s32.totalorder %s94_s16, %s94_s16 }
   0x7   :  { %p101_p3 = por %p100_p2, %p99_p1 }
   0x9   :  { %p102_p4 = pnand %p101_p3, %p95_p0 }
   0xb   :  { %105 = shalt.err (!%p102_p4)
}
   0xc   :  { %30 = dma.hbm_to_vmem [thread:$0]  %s209_s1, 512, %s28_s13, [#allocation6]  }
   0xd   :  { %s114_s19 = scalar_lea.vmem %s18_s15, 256  ;;  %p119_p6 = scmp.lt.s32.totalorder %s18_s15, %s18_s15 }
   0xe   :  { %p115_p5 = scmp.ne.s32.totalorder %s18_s15, %s114_s19  ;;  %p120_p7 = scmp.lt.s32.totalorder %s114_s19, %s114_s19 }
  0x10   :  { %p121_p8 = por %p120_p7, %p119_p6 }
  0x12   :  { %p122_p9 = pnand %p121_p8, %p115_p5 }
  0x14   :  { %125 = shalt.err (!%p122_p9)
}
  0x15   :  { %20 = dma.hbm_to_vmem [thread:$0]  %s208_s0, 256, %s18_s15, [#allocation3]  }
  0x16   :  { %s174_s22 = smov [#allocation7]  }
  0x17   :  { %s37_s23 = sshll.u32 %s174_s22, 4  ;;  %s38_s23 = int_to_ptr.vmem [resolvable:$true] %s37_s23 }
  0x18   :  { %s134_s24 = scalar_lea.vmem %s38_s23, 256  ;;  %p139_p11 = scmp.lt.s32.totalorder %s38_s23, %s38_s23 }
  0x19   :  { %p135_p10 = scmp.ne.s32.totalorder %s38_s23, %s134_s24  ;;  %p140_p12 = scmp.lt.s32.totalorder %s134_s24, %s134_s24 }
  0x1b   :  { %p141_p13 = por %p140_p12, %p139_p11 }
  0x1d   :  { %p142_p0 = pnand %p141_p13, %p135_p10 }
  0x1f   :  { %145 = shalt.err (!%p142_p0)
}
  0x20   :  { %40 = dma.hbm_to_vmem [thread:$0]  %s210_s2, 256, %s38_s23, [#allocation6]  }
  0x21   :  { %166 = dma.done.wait [#allocation3], 256  }
  0x22   :  { %167 = vsyncadd [#allocation3], 4294967040 }
  0x23   :  { %168 = dma.done.wait [#allocation6], 768  }
  0x24   :  { %169 = vsyncadd [#allocation6], 4294966528  ;;  %s175_s26 = smov [#allocation8]   ;;  %v50_v0 = vld [vmem:[#allocation2] sm:$0xff]  ;;  %v51_v1 = vld [vmem:[#allocation2 + $0x8] sm:$0xff] }
  0x25   :  { %s72_s0 = sshll.u32 %s175_s26, 4  ;;  %v54_v2 = vld [vmem:[#allocation5] sm:$0xff]  ;;  %52 = vst [vmem:[#allocation8] sm:$0xff] %v50_v0  ;;  %53 = vst [vmem:[#allocation8 + $0x8] sm:$0xff] %v51_v1  ;;  %v55_v3 = vld [vmem:[#allocation5 + $0x8] sm:$0xff]  ;;  %s73_s0 = int_to_ptr.vmem [resolvable:$true] %s72_s0 }
  0x26   :  { %58 = vst [vmem:[#allocation8 + $0x10] sm:$0xff] %v54_v2  ;;  %v56_v4 = vld [vmem:[#allocation5 + $0x10] sm:$0xff]  ;;  %v57_v5 = vld [vmem:[#allocation5 + $0x18] sm:$0xff]  ;;  %59 = vst [vmem:[#allocation8 + $0x18] sm:$0xff] %v55_v3  ;;  %s146_s2 = scalar_lea.vmem %s73_s0, 1024  ;;  %p151_p2 = scmp.lt.s32.totalorder %s73_s0, %s73_s0 }
  0x27   :  { %60 = vst [vmem:[#allocation8 + $0x20] sm:$0xff] %v56_v4  ;;  %61 = vst [vmem:[#allocation8 + $0x28] sm:$0xff] %v57_v5  ;;  %v62_v6 = vld [vmem:[#allocation7] sm:$0xff]  ;;  %v63_v7 = vld [vmem:[#allocation7 + $0x8] sm:$0xff]  ;;  %p147_p1 = scmp.ne.s32.totalorder %s73_s0, %s146_s2  ;;  %p152_p3 = scmp.lt.s32.totalorder %s146_s2, %s146_s2 }
  0x28   :  { %64 = vst [vmem:[#allocation8 + $0x30] sm:$0xff] %v62_v6  ;;  %65 = vst [vmem:[#allocation8 + $0x38] sm:$0xff] %v63_v7 }
  0x29   :  { %p153_p4 = por %p152_p3, %p151_p2 }
  0x2b   :  { %p154_p5 = pnand %p153_p4, %p147_p1 }
  0x2d   :  { %157 = shalt.err (!%p154_p5)
}
  0x2e   :  { %75 = dma.vmem_to_hbm [thread:$0]  %s73_s0, 1024, %s211_s3, [#allocation4]  }
  0x2f   :  { %170 = dma.done.wait [#allocation4], 1024  }
  0x30   :  { %171 = vsyncadd [#allocation4], 4294966272 }
  0x31   :  { %79 = vsyncpa [#allocation3], 1 }
  0x32   :  { %80 = vsyncpa [#allocation6], 1 }
  0x33   :  { %81 = vsyncpa [#allocation4], 1 }

</bundles_post_ra>
